<compile_context>
chip_gen: v5e
topology: v5e:2x2
jax: 0.10.0
libtpu: 0.0.40
codegen_flags: <defaults>
</compile_context>

<pallas_src>
import math
from functools import partial

import jax
import jax.numpy as jnp
from jax.experimental import pallas as pl
from jax.experimental.pallas import tpu as pltpu

# ---------------- config ----------------
NUM_BINS = 16
FOURIER_HALF = 64            # fourier out_dim = 2 * 64 = 128
CNN_CHANNELS = 16            # conv output channels
CNN_OUT = 128                # LABCNN feature dim
COMP_IN = 256                # 128 (fourier) + 128 (lab)
COMP_OUT = 128
H1, H2, H3 = 128, NUM_BINS, 2 * NUM_BINS
MAX_LOC_TILE = 1024          # row tile for the fused per-location kernel
MAX_HW_TILE = 2048           # (grouped) pixel-row tile for the LABCNN conv GEMM
MAX_GROUP = 8                # pixels packed per conv-GEMM row


def _round_up(x, m):
    return ((x + m - 1) // m) * m


def _pick_hw_tile(total, max_tile=MAX_HW_TILE):
    """Largest divisor of `total` that is <= max_tile and a multiple of 8."""
    if total <= max_tile:
        return total
    for d in range(max_tile - (max_tile % 8), 7, -8):
        if total % d == 0:
            return d
    return total  # fallback: whole dim (allowed as a full-extent block)


def _pick_group(hw):
    for g in (MAX_GROUP, 4, 2, 1):
        if hw % g == 0:
            return g
    return 1


# ---------------- kernels ----------------
def labcnn_kernel(hw_total, patch_ref, cw_ref, cb_ref, fw_ref, fb_ref,
                  w0lab_ref, b0_ref, o_ref, acc_ref):
    """Pixel-grouped conv GEMM + global-avg-pool + FC + per-image layer-0 term.

    grid = (B, row_tiles).  Each GEMM row holds G pixels (K = 27*G, N = 16*G,
    conv weight is block-diagonal), so the MXU push count drops ~Gx.
    acc_ref (1, 16*G) holds the running pooled sum per (group, channel) slot.
    Output (1, 1, 128) = relu(mean @ fw_tiled + fb) @ w0[128:] + b0 is written
    on the last row tile (fw_tiled = fc_w row-tiled G times, which folds the
    per-group sums back to 16 channels exactly).
    """
    t = pl.program_id(1)

    @pl.when(t == 0)
    def _init():
        acc_ref[...] = jnp.zeros_like(acc_ref)

    conv = jnp.dot(patch_ref[0], cw_ref[...],
                   preferred_element_type=jnp.float32) + cb_ref[...]
    conv = jnp.maximum(conv, 0.0)                           # (T_rows, 16*G)
    acc_ref[...] += jnp.sum(conv, axis=0, keepdims=True)    # (1, 16*G)

    @pl.when(t == pl.num_programs(1) - 1)
    def _finalize():
        pooled = acc_ref[...] * (1.0 / float(hw_total))     # global average pool
        feat = jnp.dot(pooled, fw_ref[...],
                       preferred_element_type=jnp.float32) + fb_ref[...]
        feat = jnp.maximum(feat, 0.0)                       # (1, 128) lab feature
        # Per-image layer-0 contribution: lab_feat @ w0[128:] + b0.
        o_ref[0] = jnp.dot(feat, w0lab_ref[...],
                           preferred_element_type=jnp.float32) + b0_ref[...]


def fused_loc_kernel(loc_ref, bf_ref, labc_ref, w0s_ref, w0c_ref,
                     w1, b1, w2, b2, w3, b3, w4, b4, o_ref):
    """Fourier features + CompressionLayer + ComplexColorNet, fused.

    loc:  (1, TILE_L, 2)       bf: (2, 64) with 2*pi folded in
    labc: (1, 1, 128)          per-image lab contribution (includes b0)
    out:  (1, TILE_L, NUM_BINS) raw logits (no lane padding -> minimal HBM)
    """
    x = loc_ref[0]                                           # (TILE_L, 2)
    # Fourier projection as VPU FMAs (contraction depth 2 -> skip the MXU).
    proj = x[:, 0:1] * bf_ref[0:1, :] + x[:, 1:2] * bf_ref[1:2, :]   # (TILE_L, 64)
    s = jnp.sin(proj)
    c = jnp.cos(proj)
    # Layer 0 (compression): [sin, cos] @ w0[:128] split into two matmuls
    # (avoids the lane concat), plus the per-image lab part (already + b0).
    h = (jnp.dot(s, w0s_ref[...], preferred_element_type=jnp.float32)
         + jnp.dot(c, w0c_ref[...], preferred_element_type=jnp.float32)
         + labc_ref[0])
    h = jnp.maximum(h, 0.0)
    h = jnp.maximum(jnp.dot(h, w1[...],
                            preferred_element_type=jnp.float32) + b1[...], 0.0)
    h = jnp.maximum(jnp.dot(h, w2[...],
                            preferred_element_type=jnp.float32) + b2[...], 0.0)
    h = jnp.maximum(jnp.dot(h, w3[...],
                            preferred_element_type=jnp.float32) + b3[...], 0.0)
    o_ref[0] = jnp.dot(h, w4[...],
                       preferred_element_type=jnp.float32) + b4[...]


# ---------------- pallas_call wrappers ----------------
def labcnn_forward(patches_g, cw_bd, cb_g, fw_g, fb, w0lab, b0, *, hw_total):
    b, rows, kg = patches_g.shape            # kg = 27 * G
    ng = cw_bd.shape[1]                      # 16 * G
    t_rows = _pick_hw_tile(rows)
    n_t = rows // t_rows
    return pl.pallas_call(
        partial(labcnn_kernel, hw_total),
        out_shape=jax.ShapeDtypeStruct((b, 1, COMP_OUT), jnp.float32),
        grid_spec=pltpu.PrefetchScalarGridSpec(
            num_scalar_prefetch=0,
            grid=(b, n_t),
            in_specs=[
                pl.BlockSpec((1, t_rows, kg), lambda i, t: (i, t, 0)),
                pl.BlockSpec((kg, ng), lambda i, t: (0, 0)),
                pl.BlockSpec((1, ng), lambda i, t: (0, 0)),
                pl.BlockSpec((ng, CNN_OUT), lambda i, t: (0, 0)),
                pl.BlockSpec((1, CNN_OUT), lambda i, t: (0, 0)),
                pl.BlockSpec((CNN_OUT, COMP_OUT), lambda i, t: (0, 0)),
                pl.BlockSpec((1, COMP_OUT), lambda i, t: (0, 0)),
            ],
            out_specs=pl.BlockSpec((1, 1, COMP_OUT), lambda i, t: (i, 0, 0)),
            scratch_shapes=[pltpu.VMEM((1, ng), jnp.float32)],
        ),
        compiler_params=pltpu.CompilerParams(
            dimension_semantics=("parallel", "arbitrary"),
            vmem_limit_bytes=32 * 1024 * 1024),
    )(patches_g, cw_bd, cb_g, fw_g, fb, w0lab, b0)


def fused_location_forward(locs, bf2pi, lab_contrib, w0_sin, w0_cos,
                           w1, b1, w2, b2, w3, b3, w4, b4, tile_l):
    b, l_pad, _ = locs.shape
    n_l = l_pad // tile_l
    return pl.pallas_call(
        fused_loc_kernel,
        out_shape=jax.ShapeDtypeStruct((b, l_pad, NUM_BINS), jnp.float32),
        grid_spec=pltpu.PrefetchScalarGridSpec(
            num_scalar_prefetch=0,
            grid=(b, n_l),
            in_specs=[
                pl.BlockSpec((1, tile_l, 2), lambda i, j: (i, j, 0)),
                pl.BlockSpec((2, FOURIER_HALF), lambda i, j: (0, 0)),
                pl.BlockSpec((1, 1, COMP_OUT), lambda i, j: (i, 0, 0)),
                pl.BlockSpec((FOURIER_HALF, COMP_OUT), lambda i, j: (0, 0)),
                pl.BlockSpec((FOURIER_HALF, COMP_OUT), lambda i, j: (0, 0)),
                pl.BlockSpec((COMP_OUT, H1), lambda i, j: (0, 0)),
                pl.BlockSpec((1, H1), lambda i, j: (0, 0)),
                pl.BlockSpec((H1, H2), lambda i, j: (0, 0)),
                pl.BlockSpec((1, H2), lambda i, j: (0, 0)),
                pl.BlockSpec((H2, H3), lambda i, j: (0, 0)),
                pl.BlockSpec((1, H3), lambda i, j: (0, 0)),
                pl.BlockSpec((H3, NUM_BINS), lambda i, j: (0, 0)),
                pl.BlockSpec((1, NUM_BINS), lambda i, j: (0, 0)),
            ],
            out_specs=pl.BlockSpec((1, tile_l, NUM_BINS),
                                   lambda i, j: (i, j, 0)),
        ),
        compiler_params=pltpu.CompilerParams(
            dimension_semantics=("parallel", "parallel"),
            vmem_limit_bytes=32 * 1024 * 1024),
    )(locs, bf2pi, lab_contrib, w0_sin, w0_cos,
      w1, b1, w2, b2, w3, b3, w4, b4)


# ---------------- glue ----------------
def im2col_3x3(x_nhwc):
    """(B, H, W, C) -> (B, H*W, 9*C) patches for a 3x3, pad=1, stride=1 conv."""
    b, h, w, c = x_nhwc.shape
    xp = jnp.pad(x_nhwc, ((0, 0), (1, 1), (1, 1), (0, 0)))
    cols = []
    for kh in range(3):
        for kw in range(3):
            cols.append(xp[:, kh:kh + h, kw:kw + w, :])
    patches = jnp.stack(cols, axis=-2)          # (B, H, W, 9, C)
    return patches.reshape(b, h * w, 9 * c)


def init_params(key):
    ks = jax.random.split(key, 8)
    p = {}
    p["fourier_b"] = jax.random.normal(ks[0], (2, FOURIER_HALF), jnp.float32) * 10.0
    # conv weight kept in (kh, kw, cin, cout) order -> flattened to (27, cout)
    conv_w = jax.random.normal(ks[1], (3, 3, 3, CNN_CHANNELS), jnp.float32)
    p["conv_w"] = (conv_w / math.sqrt(27.0)).reshape(27, CNN_CHANNELS)
    p["conv_b"] = jnp.zeros((1, CNN_CHANNELS), jnp.float32)
    p["fc_w"] = jax.random.normal(ks[2], (CNN_CHANNELS, CNN_OUT), jnp.float32) / math.sqrt(CNN_CHANNELS)
    p["fc_b"] = jnp.zeros((1, CNN_OUT), jnp.float32)
    p["w0"] = jax.random.normal(ks[3], (COMP_IN, COMP_OUT), jnp.float32) / math.sqrt(COMP_IN)
    p["b0"] = jnp.zeros((1, COMP_OUT), jnp.float32)
    p["w1"] = jax.random.normal(ks[4], (COMP_OUT, H1), jnp.float32) / math.sqrt(COMP_OUT)
    p["b1"] = jnp.zeros((1, H1), jnp.float32)
    p["w2"] = jax.random.normal(ks[5], (H1, H2), jnp.float32) / math.sqrt(H1)
    p["b2"] = jnp.zeros((1, H2), jnp.float32)
    p["w3"] = jax.random.normal(ks[6], (H2, H3), jnp.float32) / math.sqrt(H2)
    p["b3"] = jnp.zeros((1, H3), jnp.float32)
    p["w4"] = jax.random.normal(ks[7], (H3, NUM_BINS), jnp.float32) / math.sqrt(H3)
    p["b4"] = jnp.zeros((1, NUM_BINS), jnp.float32)
    return p


def color_expert_forward(params, locations, lab_images):
    """
    locations:  (B, num_locations, 2)        -- float32
    lab_images: (B, 3, H, W)  NCHW (PyTorch) -- float32
    returns:    (B * num_locations, NUM_BINS) raw color logits
    """
    b, num_locations, _ = locations.shape

    # ---- LABCNN path: NCHW -> NHWC, im2col (glue); pixel-grouped conv GEMM +
    # GAP + FC + per-image layer-0 lab contribution fused in one Pallas kernel.
    lab_nhwc = jnp.transpose(lab_images, (0, 2, 3, 1))
    patches = im2col_3x3(lab_nhwc)                          # (B, H*W, 27)
    # TODO(synk): replace im2col with an in-kernel 9-tap halo conv to cut the
    # conv-path HBM read inflation (~9x) at 224x224.
    hw = patches.shape[1]
    g = _pick_group(hw)
    patches_g = patches.reshape(b, hw // g, g * 27)         # G pixels per row
    cw_bd = jnp.kron(jnp.eye(g, dtype=jnp.float32), params["conv_w"])  # (27G,16G)
    cb_g = jnp.tile(params["conv_b"], (1, g))               # (1, 16G)
    fw_g = jnp.tile(params["fc_w"], (g, 1))                 # (16G, 128) fold groups
    w0_lab = params["w0"][CNN_OUT:]                         # (128, 128)
    lab_contrib = labcnn_forward(patches_g, cw_bd, cb_g, fw_g, params["fc_b"],
                                 w0_lab, params["b0"],
                                 hw_total=hw)               # (B, 1, 128)

    # ---- fused per-location path: fourier + compression + MLP in one kernel.
    tile_l = MAX_LOC_TILE if num_locations >= MAX_LOC_TILE else _round_up(num_locations, 8)
    l_pad = _round_up(num_locations, tile_l)
    locs = locations
    if l_pad != num_locations:
        locs = jnp.pad(locations, ((0, 0), (0, l_pad - num_locations), (0, 0)))

    bf2pi = params["fourier_b"] * (2.0 * jnp.pi)            # fold 2*pi into B
    w0_sin = params["w0"][:FOURIER_HALF]                    # (64, 128)
    w0_cos = params["w0"][FOURIER_HALF:CNN_OUT]             # (64, 128)

    out = fused_location_forward(locs, bf2pi, lab_contrib, w0_sin, w0_cos,
                                 params["w1"], params["b1"],
                                 params["w2"], params["b2"],
                                 params["w3"], params["b3"],
                                 params["w4"], params["b4"],
                                 tile_l)                    # (B, L_pad, 16)
    return out[:, :num_locations, :].reshape(-1, NUM_BINS)


if __name__ == "__main__":
    key = jax.random.PRNGKey(0)
    k_params, k_loc, k_img = jax.random.split(key, 3)

    params = init_params(k_params)

    B, L, IMG = 2, 8, 16   # small shapes (module default would be 224x224)
    locations = jax.random.uniform(k_loc, (B, L, 2), jnp.float32)
    lab_images = jax.random.normal(k_img, (B, 3, IMG, IMG), jnp.float32)

    fwd = jax.jit(color_expert_forward)
    out = fwd(params, locations, lab_images)
    out = jax.block_until_ready(out)
    assert out.shape == (B * L, NUM_BINS), out.shape
    assert jnp.all(jnp.isfinite(out))
    print("KERNEL_OK")
</pallas_src>

<mosaic_0001>
module attributes {stable_mosaic.version = 11 : i64} {
  func.func @labcnn_kernel(%arg0: i32, %arg1: i32, %arg2: memref<1x32x216xf32, #tpu.memory_space<vmem>>, %arg3: memref<216x128xf32, #tpu.memory_space<vmem>>, %arg4: memref<1x128xf32, #tpu.memory_space<vmem>>, %arg5: memref<128x128xf32, #tpu.memory_space<vmem>>, %arg6: memref<1x128xf32, #tpu.memory_space<vmem>>, %arg7: memref<128x128xf32, #tpu.memory_space<vmem>>, %arg8: memref<1x128xf32, #tpu.memory_space<vmem>>, %arg9: memref<1x1x128xf32, #tpu.memory_space<vmem>>, %arg10: memref<1x128xf32, #tpu.memory_space<vmem>>) attributes {dimension_semantics = [#tpu.dimension_semantics<parallel>, #tpu.dimension_semantics<arbitrary>], iteration_bounds = array<i64: 2, 1>, scalar_prefetch = 0 : i64, scratch_operands = 1 : i64, tpu.core_type = #tpu.core_type<tc>, window_params = [{transform_indices = @transform_0, window_bounds = array<i64: 1, 32, 216>}, {pipeline_mode = #tpu.pipeline_mode<synchronous>, transform_indices = @transform_1, window_bounds = array<i64: 216, 128>}, {pipeline_mode = #tpu.pipeline_mode<synchronous>, transform_indices = @transform_2, window_bounds = array<i64: 1, 128>}, {pipeline_mode = #tpu.pipeline_mode<synchronous>, transform_indices = @transform_3, window_bounds = array<i64: 128, 128>}, {pipeline_mode = #tpu.pipeline_mode<synchronous>, transform_indices = @transform_4, window_bounds = array<i64: 1, 128>}, {pipeline_mode = #tpu.pipeline_mode<synchronous>, transform_indices = @transform_5, window_bounds = array<i64: 128, 128>}, {pipeline_mode = #tpu.pipeline_mode<synchronous>, transform_indices = @transform_6, window_bounds = array<i64: 1, 128>}, {transform_indices = @transform_7, window_bounds = array<i64: 1, 1, 128>}]} {
    %c0_i32 = arith.constant 0 : i32
    %0 = arith.cmpi eq, %arg1, %c0_i32 : i32
    %1 = arith.extui %0 : i1 to i32
    %c0_i32_0 = arith.constant 0 : i32
    %2 = arith.cmpi ne, %1, %c0_i32_0 : i32
    scf.if %2 {
      %cst_15 = arith.constant 0.000000e+00 : f32
      %20 = vector.broadcast %cst_15 : f32 to vector<1x128xf32>
      %c0_16 = arith.constant 0 : index
      %c0_17 = arith.constant 0 : index
      %21 = vector.load %arg10[%c0_16, %c0_17] : memref<1x128xf32, #tpu.memory_space<vmem>>, vector<1x128xf32>
      tpu.vector_store %arg10[%c0_16, %c0_17], %20 {strides = array<i32>} : memref<1x128xf32, #tpu.memory_space<vmem>>, vector<1x128xf32>,
    } else {
    }
    %c0 = arith.constant 0 : index
    %c0_1 = arith.constant 0 : index
    %c0_2 = arith.constant 0 : index
    %3 = vector.load %arg2[%c0, %c0_1, %c0_2] : memref<1x32x216xf32, #tpu.memory_space<vmem>>, vector<1x32x216xf32>
    %4 = vector.shape_cast %3 : vector<1x32x216xf32> to vector<32x216xf32>
    %c0_3 = arith.constant 0 : index
    %c0_4 = arith.constant 0 : index
    %5 = vector.load %arg3[%c0_3, %c0_4] : memref<216x128xf32, #tpu.memory_space<vmem>>, vector<216x128xf32>
    %cst = arith.constant dense<0.000000e+00> : vector<32x128xf32>
    %6 = tpu.matmul %4, %5, %cst {dimension_numbers = #tpu.dot_dimension_numbers<[1], [0], [0], [1], [0, 0, 1, 1], [], []>} : vector<32x216xf32>, vector<216x128xf32>, vector<32x128xf32> -> vector<32x128xf32>
    %c0_5 = arith.constant 0 : index
    %c0_6 = arith.constant 0 : index
    %7 = vector.load %arg4[%c0_5, %c0_6] : memref<1x128xf32, #tpu.memory_space<vmem>>, vector<1x128xf32>
    %8 = vector.broadcast %7 : vector<1x128xf32> to vector<32x128xf32>
    %9 = arith.addf %6, %8 : vector<32x128xf32>
    %cst_7 = arith.constant 0.000000e+00 : f32
    %10 = vector.broadcast %cst_7 : f32 to vector<32x128xf32>
    %11 = arith.maximumf %9, %10 : vector<32x128xf32>
    %c0_8 = arith.constant 0 : index
    %c0_9 = arith.constant 0 : index
    %12 = vector.load %arg10[%c0_8, %c0_9] : memref<1x128xf32, #tpu.memory_space<vmem>>, vector<1x128xf32>
    %cst_10 = arith.constant dense<0.000000e+00> : vector<128xf32>
    %13 = vector.multi_reduction <add>, %11, %cst_10 [0] : vector<32x128xf32> to vector<128xf32>
    %14 = vector.shape_cast %13 : vector<128xf32> to vector<1x128xf32>
    %15 = arith.addf %12, %14 : vector<1x128xf32>
    %c0_11 = arith.constant 0 : index
    %c0_12 = arith.constant 0 : index
    %16 = vector.load %arg10[%c0_11, %c0_12] : memref<1x128xf32, #tpu.memory_space<vmem>>, vector<1x128xf32>
    tpu.vector_store %arg10[%c0_11, %c0_12], %15 {strides = array<i32>} : memref<1x128xf32, #tpu.memory_space<vmem>>, vector<1x128xf32>,
    %c0_i32_13 = arith.constant 0 : i32
    %17 = arith.cmpi eq, %arg1, %c0_i32_13 : i32
    %18 = arith.extui %17 : i1 to i32
    %c0_i32_14 = arith.constant 0 : i32
    %19 = arith.cmpi ne, %18, %c0_i32_14 : i32
    scf.if %19 {
      %c0_15 = arith.constant 0 : index
      %c0_16 = arith.constant 0 : index
      %20 = vector.load %arg10[%c0_15, %c0_16] : memref<1x128xf32, #tpu.memory_space<vmem>>, vector<1x128xf32>
      %cst_17 = arith.constant 3.906250e-03 : f32
      %21 = vector.broadcast %cst_17 : f32 to vector<1x128xf32>
      %22 = arith.mulf %20, %21 : vector<1x128xf32>
      %c0_18 = arith.constant 0 : index
      %c0_19 = arith.constant 0 : index
      %23 = vector.load %arg5[%c0_18, %c0_19] : memref<128x128xf32, #tpu.memory_space<vmem>>, vector<128x128xf32>
      %cst_20 = arith.constant dense<0.000000e+00> : vector<1x128xf32>
      %24 = tpu.matmul %22, %23, %cst_20 {dimension_numbers = #tpu.dot_dimension_numbers<[1], [0], [0], [1], [0, 0, 1, 1], [], []>} : vector<1x128xf32>, vector<128x128xf32>, vector<1x128xf32> -> vector<1x128xf32>
      %c0_21 = arith.constant 0 : index
      %c0_22 = arith.constant 0 : index
      %25 = vector.load %arg6[%c0_21, %c0_22] : memref<1x128xf32, #tpu.memory_space<vmem>>, vector<1x128xf32>
      %26 = arith.addf %24, %25 : vector<1x128xf32>
      %cst_23 = arith.constant 0.000000e+00 : f32
      %27 = vector.broadcast %cst_23 : f32 to vector<1x128xf32>
      %28 = arith.maximumf %26, %27 : vector<1x128xf32>
      %c0_24 = arith.constant 0 : index
      %c0_25 = arith.constant 0 : index
      %29 = vector.load %arg7[%c0_24, %c0_25] : memref<128x128xf32, #tpu.memory_space<vmem>>, vector<128x128xf32>
      %cst_26 = arith.constant dense<0.000000e+00> : vector<1x128xf32>
      %30 = tpu.matmul %28, %29, %cst_26 {dimension_numbers = #tpu.dot_dimension_numbers<[1], [0], [0], [1], [0, 0, 1, 1], [], []>} : vector<1x128xf32>, vector<128x128xf32>, vector<1x128xf32> -> vector<1x128xf32>
      %c0_27 = arith.constant 0 : index
      %c0_28 = arith.constant 0 : index
      %31 = vector.load %arg8[%c0_27, %c0_28] : memref<1x128xf32, #tpu.memory_space<vmem>>, vector<1x128xf32>
      %32 = arith.addf %30, %31 : vector<1x128xf32>
      %c0_29 = arith.constant 0 : index
      %c0_30 = arith.constant 0 : index
      %c0_31 = arith.constant 0 : index
      %33 = vector.load %arg9[%c0_29, %c0_30, %c0_31] : memref<1x1x128xf32, #tpu.memory_space<vmem>>, vector<1x1x128xf32>
      %34 = vector.shape_cast %33 : vector<1x1x128xf32> to vector<1x128xf32>
      %35 = vector.shape_cast %32 : vector<1x128xf32> to vector<1x1x128xf32>
      tpu.vector_store %arg9[%c0_29, %c0_30, %c0_31], %35 {strides = array<i32>} : memref<1x1x128xf32, #tpu.memory_space<vmem>>, vector<1x1x128xf32>,
    } else {
    }
    return
  }
  func.func @transform_0(%arg0: i32, %arg1: i32) -> (i32, i32, i32) {
    %c0_i32 = arith.constant 0 : i32
    %c0_i32_0 = arith.constant 0 : i32
    return %arg0, %arg1, %c0_i32 : i32, i32, i32
  }
  func.func @transform_1(%arg0: i32, %arg1: i32) -> (i32, i32) {
    %c0_i32 = arith.constant 0 : i32
    %c0_i32_0 = arith.constant 0 : i32
    %c0_i32_1 = arith.constant 0 : i32
    return %c0_i32, %c0_i32_0 : i32, i32
  }
  func.func @transform_2(%arg0: i32, %arg1: i32) -> (i32, i32) {
    %c0_i32 = arith.constant 0 : i32
    %c0_i32_0 = arith.constant 0 : i32
    %c0_i32_1 = arith.constant 0 : i32
    return %c0_i32, %c0_i32_0 : i32, i32
  }
  func.func @transform_3(%arg0: i32, %arg1: i32) -> (i32, i32) {
    %c0_i32 = arith.constant 0 : i32
    %c0_i32_0 = arith.constant 0 : i32
    %c0_i32_1 = arith.constant 0 : i32
    return %c0_i32, %c0_i32_0 : i32, i32
  }
  func.func @transform_4(%arg0: i32, %arg1: i32) -> (i32, i32) {
    %c0_i32 = arith.constant 0 : i32
    %c0_i32_0 = arith.constant 0 : i32
    %c0_i32_1 = arith.constant 0 : i32
    return %c0_i32, %c0_i32_0 : i32, i32
  }
  func.func @transform_5(%arg0: i32, %arg1: i32) -> (i32, i32) {
    %c0_i32 = arith.constant 0 : i32
    %c0_i32_0 = arith.constant 0 : i32
    %c0_i32_1 = arith.constant 0 : i32
    return %c0_i32, %c0_i32_0 : i32, i32
  }
  func.func @transform_6(%arg0: i32, %arg1: i32) -> (i32, i32) {
    %c0_i32 = arith.constant 0 : i32
    %c0_i32_0 = arith.constant 0 : i32
    %c0_i32_1 = arith.constant 0 : i32
    return %c0_i32, %c0_i32_0 : i32, i32
  }
  func.func @transform_7(%arg0: i32, %arg1: i32) -> (i32, i32, i32) {
    %c0_i32 = arith.constant 0 : i32
    %c0_i32_0 = arith.constant 0 : i32
    %c0_i32_1 = arith.constant 0 : i32
    return %arg0, %c0_i32, %c0_i32_0 : i32, i32, i32
  }
}

module attributes {stable_mosaic.version = 11 : i64} {
  func.func @fused_loc_kernel(%arg0: i32, %arg1: i32, %arg2: memref<1x8x2xf32, #tpu.memory_space<vmem>>, %arg3: memref<2x64xf32, #tpu.memory_space<vmem>>, %arg4: memref<1x1x128xf32, #tpu.memory_space<vmem>>, %arg5: memref<64x128xf32, #tpu.memory_space<vmem>>, %arg6: memref<64x128xf32, #tpu.memory_space<vmem>>, %arg7: memref<128x128xf32, #tpu.memory_space<vmem>>, %arg8: memref<1x128xf32, #tpu.memory_space<vmem>>, %arg9: memref<128x16xf32, #tpu.memory_space<vmem>>, %arg10: memref<1x16xf32, #tpu.memory_space<vmem>>, %arg11: memref<16x32xf32, #tpu.memory_space<vmem>>, %arg12: memref<1x32xf32, #tpu.memory_space<vmem>>, %arg13: memref<32x16xf32, #tpu.memory_space<vmem>>, %arg14: memref<1x16xf32, #tpu.memory_space<vmem>>, %arg15: memref<1x8x16xf32, #tpu.memory_space<vmem>>) attributes {dimension_semantics = [#tpu.dimension_semantics<parallel>, #tpu.dimension_semantics<parallel>], iteration_bounds = array<i64: 2, 1>, scalar_prefetch = 0 : i64, scratch_operands = 0 : i64, tpu.core_type = #tpu.core_type<tc>, window_params = [{transform_indices = @transform_0, window_bounds = array<i64: 1, 8, 2>}, {pipeline_mode = #tpu.pipeline_mode<synchronous>, transform_indices = @transform_1, window_bounds = array<i64: 2, 64>}, {transform_indices = @transform_2, window_bounds = array<i64: 1, 1, 128>}, {pipeline_mode = #tpu.pipeline_mode<synchronous>, transform_indices = @transform_3, window_bounds = array<i64: 64, 128>}, {pipeline_mode = #tpu.pipeline_mode<synchronous>, transform_indices = @transform_4, window_bounds = array<i64: 64, 128>}, {pipeline_mode = #tpu.pipeline_mode<synchronous>, transform_indices = @transform_5, window_bounds = array<i64: 128, 128>}, {pipeline_mode = #tpu.pipeline_mode<synchronous>, transform_indices = @transform_6, window_bounds = array<i64: 1, 128>}, {pipeline_mode = #tpu.pipeline_mode<synchronous>, transform_indices = @transform_7, window_bounds = array<i64: 128, 16>}, {pipeline_mode = #tpu.pipeline_mode<synchronous>, transform_indices = @transform_8, window_bounds = array<i64: 1, 16>}, {pipeline_mode = #tpu.pipeline_mode<synchronous>, transform_indices = @transform_9, window_bounds = array<i64: 16, 32>}, {pipeline_mode = #tpu.pipeline_mode<synchronous>, transform_indices = @transform_10, window_bounds = array<i64: 1, 32>}, {pipeline_mode = #tpu.pipeline_mode<synchronous>, transform_indices = @transform_11, window_bounds = array<i64: 32, 16>}, {pipeline_mode = #tpu.pipeline_mode<synchronous>, transform_indices = @transform_12, window_bounds = array<i64: 1, 16>}, {transform_indices = @transform_13, window_bounds = array<i64: 1, 8, 16>}]} {
    %c0 = arith.constant 0 : index
    %c0_0 = arith.constant 0 : index
    %c0_1 = arith.constant 0 : index
    %0 = vector.load %arg2[%c0, %c0_0, %c0_1] : memref<1x8x2xf32, #tpu.memory_space<vmem>>, vector<1x8x2xf32>
    %1 = vector.shape_cast %0 : vector<1x8x2xf32> to vector<8x2xf32>
    %2 = vector.extract_strided_slice %1 {offsets = [0, 0], sizes = [8, 1], strides = [1, 1]} : vector<8x2xf32> to vector<8x1xf32>
    %c0_2 = arith.constant 0 : index
    %c0_3 = arith.constant 0 : index
    %3 = vector.load %arg3[%c0_2, %c0_3] : memref<2x64xf32, #tpu.memory_space<vmem>>, vector<1x64xf32>
    %4 = vector.broadcast %2 : vector<8x1xf32> to vector<8x64xf32>
    %5 = vector.broadcast %3 : vector<1x64xf32> to vector<8x64xf32>
    %6 = arith.mulf %4, %5 : vector<8x64xf32>
    %7 = vector.extract_strided_slice %1 {offsets = [0, 1], sizes = [8, 1], strides = [1, 1]} : vector<8x2xf32> to vector<8x1xf32>
    %c1 = arith.constant 1 : index
    %c0_4 = arith.constant 0 : index
    %8 = vector.load %arg3[%c1, %c0_4] : memref<2x64xf32, #tpu.memory_space<vmem>>, vector<1x64xf32>
    %9 = vector.broadcast %7 : vector<8x1xf32> to vector<8x64xf32>
    %10 = vector.broadcast %8 : vector<1x64xf32> to vector<8x64xf32>
    %11 = arith.mulf %9, %10 : vector<8x64xf32>
    %12 = arith.addf %6, %11 : vector<8x64xf32>
    %13 = math.sin %12 : vector<8x64xf32>
    %14 = math.cos %12 : vector<8x64xf32>
    %c0_5 = arith.constant 0 : index
    %c0_6 = arith.constant 0 : index
    %15 = vector.load %arg5[%c0_5, %c0_6] : memref<64x128xf32, #tpu.memory_space<vmem>>, vector<64x128xf32>
    %cst = arith.constant dense<0.000000e+00> : vector<8x128xf32>
    %16 = tpu.matmul %13, %15, %cst {dimension_numbers = #tpu.dot_dimension_numbers<[1], [0], [0], [1], [0, 0, 1, 1], [], []>} : vector<8x64xf32>, vector<64x128xf32>, vector<8x128xf32> -> vector<8x128xf32>
    %c0_7 = arith.constant 0 : index
    %c0_8 = arith.constant 0 : index
    %17 = vector.load %arg6[%c0_7, %c0_8] : memref<64x128xf32, #tpu.memory_space<vmem>>, vector<64x128xf32>
    %cst_9 = arith.constant dense<0.000000e+00> : vector<8x128xf32>
    %18 = tpu.matmul %14, %17, %cst_9 {dimension_numbers = #tpu.dot_dimension_numbers<[1], [0], [0], [1], [0, 0, 1, 1], [], []>} : vector<8x64xf32>, vector<64x128xf32>, vector<8x128xf32> -> vector<8x128xf32>
    %19 = arith.addf %16, %18 : vector<8x128xf32>
    %c0_10 = arith.constant 0 : index
    %c0_11 = arith.constant 0 : index
    %c0_12 = arith.constant 0 : index
    %20 = vector.load %arg4[%c0_10, %c0_11, %c0_12] : memref<1x1x128xf32, #tpu.memory_space<vmem>>, vector<1x1x128xf32>
    %21 = vector.shape_cast %20 : vector<1x1x128xf32> to vector<1x128xf32>
    %22 = vector.broadcast %21 : vector<1x128xf32> to vector<8x128xf32>
    %23 = arith.addf %19, %22 : vector<8x128xf32>
    %cst_13 = arith.constant 0.000000e+00 : f32
    %24 = vector.broadcast %cst_13 : f32 to vector<8x128xf32>
    %25 = arith.maximumf %23, %24 : vector<8x128xf32>
    %c0_14 = arith.constant 0 : index
    %c0_15 = arith.constant 0 : index
    %26 = vector.load %arg7[%c0_14, %c0_15] : memref<128x128xf32, #tpu.memory_space<vmem>>, vector<128x128xf32>
    %cst_16 = arith.constant dense<0.000000e+00> : vector<8x128xf32>
    %27 = tpu.matmul %25, %26, %cst_16 {dimension_numbers = #tpu.dot_dimension_numbers<[1], [0], [0], [1], [0, 0, 1, 1], [], []>} : vector<8x128xf32>, vector<128x128xf32>, vector<8x128xf32> -> vector<8x128xf32>
    %c0_17 = arith.constant 0 : index
    %c0_18 = arith.constant 0 : index
    %28 = vector.load %arg8[%c0_17, %c0_18] : memref<1x128xf32, #tpu.memory_space<vmem>>, vector<1x128xf32>
    %29 = vector.broadcast %28 : vector<1x128xf32> to vector<8x128xf32>
    %30 = arith.addf %27, %29 : vector<8x128xf32>
    %cst_19 = arith.constant 0.000000e+00 : f32
    %31 = vector.broadcast %cst_19 : f32 to vector<8x128xf32>
    %32 = arith.maximumf %30, %31 : vector<8x128xf32>
    %c0_20 = arith.constant 0 : index
    %c0_21 = arith.constant 0 : index
    %33 = vector.load %arg9[%c0_20, %c0_21] : memref<128x16xf32, #tpu.memory_space<vmem>>, vector<128x16xf32>
    %cst_22 = arith.constant dense<0.000000e+00> : vector<8x16xf32>
    %34 = tpu.matmul %32, %33, %cst_22 {dimension_numbers = #tpu.dot_dimension_numbers<[1], [0], [0], [1], [0, 0, 1, 1], [], []>} : vector<8x128xf32>, vector<128x16xf32>, vector<8x16xf32> -> vector<8x16xf32>
    %c0_23 = arith.constant 0 : index
    %c0_24 = arith.constant 0 : index
    %35 = vector.load %arg10[%c0_23, %c0_24] : memref<1x16xf32, #tpu.memory_space<vmem>>, vector<1x16xf32>
    %36 = vector.broadcast %35 : vector<1x16xf32> to vector<8x16xf32>
    %37 = arith.addf %34, %36 : vector<8x16xf32>
    %cst_25 = arith.constant 0.000000e+00 : f32
    %38 = vector.broadcast %cst_25 : f32 to vector<8x16xf32>
    %39 = arith.maximumf %37, %38 : vector<8x16xf32>
    %c0_26 = arith.constant 0 : index
    %c0_27 = arith.constant 0 : index
    %40 = vector.load %arg11[%c0_26, %c0_27] : memref<16x32xf32, #tpu.memory_space<vmem>>, vector<16x32xf32>
    %cst_28 = arith.constant dense<0.000000e+00> : vector<8x32xf32>
    %41 = tpu.matmul %39, %40, %cst_28 {dimension_numbers = #tpu.dot_dimension_numbers<[1], [0], [0], [1], [0, 0, 1, 1], [], []>} : vector<8x16xf32>, vector<16x32xf32>, vector<8x32xf32> -> vector<8x32xf32>
    %c0_29 = arith.constant 0 : index
    %c0_30 = arith.constant 0 : index
    %42 = vector.load %arg12[%c0_29, %c0_30] : memref<1x32xf32, #tpu.memory_space<vmem>>, vector<1x32xf32>
    %43 = vector.broadcast %42 : vector<1x32xf32> to vector<8x32xf32>
    %44 = arith.addf %41, %43 : vector<8x32xf32>
    %cst_31 = arith.constant 0.000000e+00 : f32
    %45 = vector.broadcast %cst_31 : f32 to vector<8x32xf32>
    %46 = arith.maximumf %44, %45 : vector<8x32xf32>
    %c0_32 = arith.constant 0 : index
    %c0_33 = arith.constant 0 : index
    %47 = vector.load %arg13[%c0_32, %c0_33] : memref<32x16xf32, #tpu.memory_space<vmem>>, vector<32x16xf32>
    %cst_34 = arith.constant dense<0.000000e+00> : vector<8x16xf32>
    %48 = tpu.matmul %46, %47, %cst_34 {dimension_numbers = #tpu.dot_dimension_numbers<[1], [0], [0], [1], [0, 0, 1, 1], [], []>} : vector<8x32xf32>, vector<32x16xf32>, vector<8x16xf32> -> vector<8x16xf32>
    %c0_35 = arith.constant 0 : index
    %c0_36 = arith.constant 0 : index
    %49 = vector.load %arg14[%c0_35, %c0_36] : memref<1x16xf32, #tpu.memory_space<vmem>>, vector<1x16xf32>
    %50 = vector.broadcast %49 : vector<1x16xf32> to vector<8x16xf32>
    %51 = arith.addf %48, %50 : vector<8x16xf32>
    %c0_37 = arith.constant 0 : index
    %c0_38 = arith.constant 0 : index
    %c0_39 = arith.constant 0 : index
    %52 = vector.load %arg15[%c0_37, %c0_38, %c0_39] : memref<1x8x16xf32, #tpu.memory_space<vmem>>, vector<1x8x16xf32>
    %53 = vector.shape_cast %52 : vector<1x8x16xf32> to vector<8x16xf32>
    %54 = vector.shape_cast %51 : vector<8x16xf32> to vector<1x8x16xf32>
    tpu.vector_store %arg15[%c0_37, %c0_38, %c0_39], %54 {strides = array<i32>} : memref<1x8x16xf32, #tpu.memory_space<vmem>>, vector<1x8x16xf32>,
    return
  }
  func.func @transform_0(%arg0: i32, %arg1: i32) -> (i32, i32, i32) {
    %c0_i32 = arith.constant 0 : i32
    %c0_i32_0 = arith.constant 0 : i32
    return %arg0, %arg1, %c0_i32 : i32, i32, i32
  }
  func.func @transform_1(%arg0: i32, %arg1: i32) -> (i32, i32) {
    %c0_i32 = arith.constant 0 : i32
    %c0_i32_0 = arith.constant 0 : i32
    %c0_i32_1 = arith.constant 0 : i32
    return %c0_i32, %c0_i32_0 : i32, i32
  }
  func.func @transform_2(%arg0: i32, %arg1: i32) -> (i32, i32, i32) {
    %c0_i32 = arith.constant 0 : i32
    %c0_i32_0 = arith.constant 0 : i32
    %c0_i32_1 = arith.constant 0 : i32
    return %arg0, %c0_i32, %c0_i32_0 : i32, i32, i32
  }
  func.func @transform_3(%arg0: i32, %arg1: i32) -> (i32, i32) {
    %c0_i32 = arith.constant 0 : i32
    %c0_i32_0 = arith.constant 0 : i32
    %c0_i32_1 = arith.constant 0 : i32
    return %c0_i32, %c0_i32_0 : i32, i32
  }
  func.func @transform_4(%arg0: i32, %arg1: i32) -> (i32, i32) {
    %c0_i32 = arith.constant 0 : i32
    %c0_i32_0 = arith.constant 0 : i32
    %c0_i32_1 = arith.constant 0 : i32
    return %c0_i32, %c0_i32_0 : i32, i32
  }
  func.func @transform_5(%arg0: i32, %arg1: i32) -> (i32, i32) {
    %c0_i32 = arith.constant 0 : i32
    %c0_i32_0 = arith.constant 0 : i32
    %c0_i32_1 = arith.constant 0 : i32
    return %c0_i32, %c0_i32_0 : i32, i32
  }
  func.func @transform_6(%arg0: i32, %arg1: i32) -> (i32, i32) {
    %c0_i32 = arith.constant 0 : i32
    %c0_i32_0 = arith.constant 0 : i32
    %c0_i32_1 = arith.constant 0 : i32
    return %c0_i32, %c0_i32_0 : i32, i32
  }
  func.func @transform_7(%arg0: i32, %arg1: i32) -> (i32, i32) {
    %c0_i32 = arith.constant 0 : i32
    %c0_i32_0 = arith.constant 0 : i32
    %c0_i32_1 = arith.constant 0 : i32
    return %c0_i32, %c0_i32_0 : i32, i32
  }
  func.func @transform_8(%arg0: i32, %arg1: i32) -> (i32, i32) {
    %c0_i32 = arith.constant 0 : i32
    %c0_i32_0 = arith.constant 0 : i32
    %c0_i32_1 = arith.constant 0 : i32
    return %c0_i32, %c0_i32_0 : i32, i32
  }
  func.func @transform_9(%arg0: i32, %arg1: i32) -> (i32, i32) {
    %c0_i32 = arith.constant 0 : i32
    %c0_i32_0 = arith.constant 0 : i32
    %c0_i32_1 = arith.constant 0 : i32
    return %c0_i32, %c0_i32_0 : i32, i32
  }
  func.func @transform_10(%arg0: i32, %arg1: i32) -> (i32, i32) {
    %c0_i32 = arith.constant 0 : i32
    %c0_i32_0 = arith.constant 0 : i32
    %c0_i32_1 = arith.constant 0 : i32
    return %c0_i32, %c0_i32_0 : i32, i32
  }
  func.func @transform_11(%arg0: i32, %arg1: i32) -> (i32, i32) {
    %c0_i32 = arith.constant 0 : i32
    %c0_i32_0 = arith.constant 0 : i32
    %c0_i32_1 = arith.constant 0 : i32
    return %c0_i32, %c0_i32_0 : i32, i32
  }
  func.func @transform_12(%arg0: i32, %arg1: i32) -> (i32, i32) {
    %c0_i32 = arith.constant 0 : i32
    %c0_i32_0 = arith.constant 0 : i32
    %c0_i32_1 = arith.constant 0 : i32
    return %c0_i32, %c0_i32_0 : i32, i32
  }
  func.func @transform_13(%arg0: i32, %arg1: i32) -> (i32, i32, i32) {
    %c0_i32 = arith.constant 0 : i32
    %c0_i32_0 = arith.constant 0 : i32
    return %arg0, %arg1, %c0_i32 : i32, i32, i32
  }
}

</mosaic_0001>

<bundles_post_ra>
// kernel: color_expert_forward.2
= control target key start
LH: loop header
LB: loop body
LE: loop exit
PB: predicated region body
PF: predicated region fallthrough
CT: control target
= control target key end

     0   :  { %s687_s24 = smov 0   ;;  %s689_s25 = smov 0   ;;  %s918_s0 = inlined_call_operand.vmem [shape: f32[2,32,216], index: 0, kind: input, shape index: {}]   ;;  %s919_s1 = inlined_call_operand.vmem [shape: f32[216,128], index: 1, kind: input, shape index: {}]   ;;  %s920_s2 = inlined_call_operand.vmem [shape: f32[1,128], index: 2, kind: input, shape index: {}]   ;;  %s921_s3 = inlined_call_operand.vmem [shape: f32[128,128], index: 3, kind: input, shape index: {}]   ;;  %s922_s4 = inlined_call_operand.vmem [shape: f32[1,128], index: 4, kind: input, shape index: {}]   ;;  %s923_s5 = inlined_call_operand.vmem [shape: f32[128,128], index: 5, kind: input, shape index: {}]   ;;  %s924_s6 = inlined_call_operand.vmem [shape: f32[1,128], index: 6, kind: input, shape index: {}]   ;;  %s925_s7 = inlined_call_operand.vmem [shape: f32[2,1,128], index: 7, kind: output, shape index: {}]  }
   0x1   :  { %s691_s26 = smov 0  }
   0x2 LB: > { %s29_s27 = sadd.s32 1, %s640_s25  ;;  %p586_p0 = scmp.ge.s32.totalorder %s644_s26, 1  ;;  %s644_s26 = sphi %s691_s26, %s17_s26   ;;  %s640_s25 = sphi %s689_s25, %s927_s25   ;;  %s636_s24 = sphi %s687_s24, %s926_s24  }
   0x3   : > { %p31_p1 = scmp.ge.s32.totalorder %s29_s27, 2  ;;  %p257_p2 = scmp.lt.s32.totalorder %s644_s26, 3 }
   0x5   : > { %s929_s27 = smov (%p31_p1, %s29_s27), 0  ;;  %p258_p3 = pnand %p586_p0, %p257_p2 }
   0x6   : > { %p293_p4 = scmp.lt.s32.totalorder (!%p258_p3), %s636_s24, 1 }
   0x7   : > { %261 = sbr.rel (%p258_p3) target bundleno = 497 (0x1f1), region = 48 }
   0xc   : > { %v334_v0 = vld [vmem:[%s919_s1 + $0x78] sm:$0xff]  ;;  %v333_v1 = vld [vmem:[%s919_s1 + $0x70] sm:$0xff]  ;;  %v332_v2 = vld [vmem:[%s919_s1 + $0x68] sm:$0xff]  ;;  %s931_s24 = smov (!%p293_p4, %s636_s24), 1  ;;  %vm350_vm0 = vcmask 719872   ;;  %v646_v37 = vmov 0.0  }
   0xd   : > { %363 = vmatpush.msra.mxu0 %v334_v0  ;;  %v345_v3 = vld [vmem:[%s919_s1 + $0xd0] sm:$0xff]  ;;  %v344_v4 = vld [vmem:[%s919_s1 + $0xc8] sm:$0xff]  ;;  %v331_v5 = vld [vmem:[%s919_s1 + $0x60] sm:$0xff]  ;;  %s595_s28 = sshll.u32 %s931_s24, 6  ;;  %310 = vst [vmem:[#allocation2] sm:$0x1] %v646_v37  ;;  %s305_s21 = scalar_lea.vmem %s925_s7, %s931_s24 }
   0xe   : > { %397 = vmatpush.msra.mxu1 %v345_v3  ;;  %v343_v6 = vld [vmem:[%s919_s1 + $0xc0] sm:$0xff]  ;;  %v330_v7 = vld [vmem:[%s919_s1 + $0x58] sm:$0xff]  ;;  %v329_v9 = vld [vmem:[%s919_s1 + $0x50] sm:$0xff]  ;;  %s301_s14 = scalar_lea.vmem %s918_s0, %s595_s28 }
   0xf   : > { %364 = vmatpush.msra.mxu0 %v333_v1  ;;  %v342_v8 = vld [vmem:[%s919_s1 + $0xb8] sm:$0xff]  ;;  %v341_v10 = vld [vmem:[%s919_s1 + $0xb0] sm:$0xff]  ;;  %v328_v11 = vld [vmem:[%s919_s1 + $0x48] sm:$0xff] }
  0x10   : > { %398 = vmatpush.msra.mxu1 %v344_v4  ;;  %v340_v12 = vld [vmem:[%s919_s1 + $0xa8] sm:$0xff]  ;;  %v327_v13 = vld [vmem:[%s919_s1 + $0x40] sm:$0xff]  ;;  %v326_v15 = vld [vmem:[%s919_s1 + $0x38] sm:$0xff] }
  0x11   : > { %365 = vmatpush.msra.mxu0 %v332_v2  ;;  %v339_v14 = vld [vmem:[%s919_s1 + $0xa0] sm:$0xff]  ;;  %v338_v16 = vld [vmem:[%s919_s1 + $0x98] sm:$0xff]  ;;  %v325_v17 = vld [vmem:[%s919_s1 + $0x30] sm:$0xff] }
  0x12   : > { %399 = vmatpush.msra.mxu1 %v343_v6  ;;  %v337_v18 = vld [vmem:[%s919_s1 + $0x90] sm:$0xff]  ;;  %v324_v19 = vld [vmem:[%s919_s1 + $0x28] sm:$0xff]  ;;  %v323_v21 = vld [vmem:[%s919_s1 + $0x20] sm:$0xff] }
  0x13   : > { %366 = vmatpush.msra.mxu0 %v331_v5  ;;  %v336_v20 = vld [vmem:[%s919_s1 + $0x88] sm:$0xff]  ;;  %v335_v22 = vld [vmem:[%s919_s1 + $0x80] sm:$0xff]  ;;  %v322_v24 = vld [vmem:[%s919_s1 + $0x18] sm:$0xff] }
  0x14   : > { %400 = vmatpush.msra.mxu1 %v342_v8  ;;  %v312_v23 = vld [vmem:[%s301_s14 + $0x8] sm:$0xff]  ;;  %v321_v25 = vld [vmem:[%s919_s1 + $0x10] sm:$0xff]  ;;  %v319_v27 = vld [vmem:[%s919_s1] sm:$0xff] }
  0x15   : > { %367 = vmatpush.msra.mxu0 %v330_v7  ;;  %v320_v26 = vld [vmem:[%s919_s1 + $0x8] sm:$0xff]  ;;  %v311_v28 = vld [vmem:[%s301_s14] sm:$0xff]  ;;  %v314_v29 = vld [vmem:[%s301_s14 + $0x18] sm:$0xff] }
  0x16   : > { %401 = vmatpush.msra.mxu1 %v341_v10  ;;  %v313_v30 = vld [vmem:[%s301_s14 + $0x10] sm:$0xff]  ;;  %v316_v31 = vld [vmem:[%s301_s14 + $0x28] sm:$0xff]  ;;  %v315_v32 = vld [vmem:[%s301_s14 + $0x20] sm:$0xff] }
  0x17   : > { %368 = vmatpush.msra.mxu0 %v329_v9  ;;  %v318_v33 = vld [vmem:[%s301_s14 + $0x38] sm:$0xff]  ;;  %v317_v34 = vld [vmem:[%s301_s14 + $0x30] sm:$0xff]  ;;  %v455_v39 = vld [vmem:[%s921_s3 + $0x68] sm:$0xff] }
  0x18   : > { %402 = vmatpush.msra.mxu1 %v340_v12  ;;  %v457_v35 = vld [vmem:[%s921_s3 + $0x78] sm:$0xff]  ;;  %v456_v38 = vld [vmem:[%s921_s3 + $0x70] sm:$0xff]  ;;  %v454_v40 = vld [vmem:[%s921_s3 + $0x60] sm:$0xff] }
  0x19   : > { %369 = vmatpush.msra.mxu0 %v328_v11  ;;  %459 = vmatpush.msra.mxu2 %v457_v35  ;;  %v453_v42 = vld [vmem:[%s921_s3 + $0x58] sm:$0xff]  ;;  %v452_v43 = vld [vmem:[%s921_s3 + $0x50] sm:$0xff]  ;;  %v451_v45 = vld [vmem:[%s921_s3 + $0x48] sm:$0xff] }
  0x1a   : > { %403 = vmatpush.msra.mxu1 %v339_v14  ;;  %v450_v46 = vld [vmem:[%s921_s3 + $0x40] sm:$0xff]  ;;  %v449_v48 = vld [vmem:[%s921_s3 + $0x38] sm:$0xff]  ;;  %v448_v49 = vld [vmem:[%s921_s3 + $0x30] sm:$0xff] }
  0x1b   : > { %370 = vmatpush.msra.mxu0 %v327_v13  ;;  %460 = vmatpush.msra.mxu2 %v456_v38  ;;  %v621_v50 = vld [vmem:[%s920_s2] ss:$0 sm:$0xff]  ;;  %v447_v51 = vld [vmem:[%s921_s3 + $0x28] sm:$0xff]  ;;  %v445_v55 = vld [vmem:[%s921_s3 + $0x18] sm:$0xff] }
  0x1c   : > { %404 = vmatpush.msra.mxu1 %v338_v16  ;;  %v446_v54 = vld [vmem:[%s921_s3 + $0x20] sm:$0xff]  ;;  %v444_v59 = vld [vmem:[%s921_s3 + $0x10] sm:$0xff]  ;;  %v443_v61 = vld [vmem:[%s921_s3 + $0x8] sm:$0xff] }
  0x1d   : > { %371 = vmatpush.msra.mxu0 %v326_v15  ;;  %461 = vmatpush.msra.mxu2 %v455_v39  ;;  %v442_v0 = vld [vmem:[%s921_s3] sm:$0xff]  ;;  %v495_v7 = vld [vmem:[%s923_s5 + $0x78] sm:$0xff]  ;;  %v494_v8 = vld [vmem:[%s923_s5 + $0x70] sm:$0xff] }
  0x1e   : > { %405 = vmatpush.msra.mxu1 %v337_v18  ;;  %497 = vmatpush.msra.mxu3 %v495_v7  ;;  %v493_v11 = vld [vmem:[%s923_s5 + $0x68] sm:$0xff]  ;;  %v492_v14 = vld [vmem:[%s923_s5 + $0x60] sm:$0xff]  ;;  %v491_v16 = vld [vmem:[%s923_s5 + $0x58] sm:$0xff] }
  0x1f   : > { %372 = vmatpush.msra.mxu0 %v325_v17  ;;  %462 = vmatpush.msra.mxu2 %v454_v40  ;;  %v490_v18 = vld [vmem:[%s923_s5 + $0x50] sm:$0xff]  ;;  %v480_v37 = vld [vmem:[%s923_s5] sm:$0xff] }
  0x20   : > { %406 = vmatpush.msra.mxu1 %v336_v20  ;;  %498 = vmatpush.msra.mxu3 %v494_v8  ;;  %v489_v20 = vld [vmem:[%s923_s5 + $0x48] sm:$0xff]  ;;  %v482_v35 = vld [vmem:[%s923_s5 + $0x10] sm:$0xff]  ;;  %v458_v38 = vld [vmem:[%s922_s4] sm:$0x1] }
  0x21   : > { %373 = vmatpush.msra.mxu0 %v324_v19  ;;  %463 = vmatpush.msra.mxu2 %v453_v42  ;;  %v496_v42 = vld [vmem:[%s924_s6] sm:$0x1] }
  0x22   : > { %407 = vmatpush.msra.mxu1 %v335_v22  ;;  %499 = vmatpush.msra.mxu3 %v493_v11  ;;  %v488_v22 = vld [vmem:[%s923_s5 + $0x40] sm:$0xff] }
  0x23   : > { %374 = vmatpush.msra.mxu0 %v323_v21  ;;  %589 = vmatmul.msk.f32.vlgmr.msra.gmra.mxu1 %vm350_vm0, %v312_v23 }
  0x24   : > { %464 = vmatpush.msra.mxu2 %v452_v43  ;;  %500 = vmatpush.msra.mxu3 %v492_v14 }
  0x25   : > { %375 = vmatpush.msra.mxu0 %v322_v24  ;;  %v487_v24 = vld [vmem:[%s923_s5 + $0x38] sm:$0xff] }
  0x26   : > { %465 = vmatpush.msra.mxu2 %v451_v45  ;;  %501 = vmatpush.msra.mxu3 %v491_v16 }
  0x27   : > { %376 = vmatpush.msra.mxu0 %v321_v25 }
  0x28   : > { %466 = vmatpush.msra.mxu2 %v450_v46  ;;  %502 = vmatpush.msra.mxu3 %v490_v18 }
  0x29   : > { %377 = vmatpush.msra.mxu0 %v320_v26  ;;  %v486_v26 = vld [vmem:[%s923_s5 + $0x30] sm:$0xff] }
  0x2a   : > { %467 = vmatpush.msra.mxu2 %v449_v48  ;;  %503 = vmatpush.msra.mxu3 %v489_v20 }
  0x2b   : > { %378 = vmatpush.msra.mxu0 %v319_v27  ;;  %590 = vmatmul.msk.f32.gmra.mxu1 %vm350_vm0, %v314_v29  ;;  %v425_v27 = vld [vmem:[#allocation2] sm:$0x1]  ;;  %v485_v29 = vld [vmem:[%s923_s5 + $0x28] sm:$0xff] }
  0x2c   : > { %379 = vmatmul.f32.vlgmr.msra.gmra.mxu0 %v311_v28  ;;  %468 = vmatpush.msra.mxu2 %v448_v49 }
  0x2d   : > { %504 = vmatpush.msra.mxu3 %v488_v22 }
  0x2e   : > { %469 = vmatpush.msra.mxu2 %v447_v51 }
  0x2f   : > { %505 = vmatpush.msra.mxu3 %v487_v24 }
  0x30   : > { %470 = vmatpush.msra.mxu2 %v446_v54 }
  0x31   : > { %506 = vmatpush.msra.mxu3 %v486_v26 }
  0x32   : > { %471 = vmatpush.msra.mxu2 %v445_v55 }
  0x33   : > { %591 = vmatmul.msk.f32.gmra.mxu1 %vm350_vm0, %v316_v31  ;;  %v484_v31 = vld [vmem:[%s923_s5 + $0x20] sm:$0xff]  ;;  %507 = vmatpush.msra.mxu3 %v485_v29 }
  0x34   : > { %382 = vmatmul.f32.gmra.mxu0 %v313_v30  ;;  %472 = vmatpush.msra.mxu2 %v444_v59 }
  0x35   : > { %508 = vmatpush.msra.mxu3 %v484_v31 }
  0x36   : > { %473 = vmatpush.msra.mxu2 %v443_v61 }
  0x38   : > { %474 = vmatpush.msra.mxu2 %v442_v0 }
  0x3b   : > { %592 = vmatmul.msk.f32.gmra.mxu1 %vm350_vm0, %v318_v33 }
  0x3c   : > { %385 = vmatmul.f32.gmra.mxu0 %v315_v32  ;;  %v483_v32 = vld [vmem:[%s923_s5 + $0x18] sm:$0xff] }
  0x3d   : > { %509 = vmatpush.msra.mxu3 %v483_v32 }
  0x3f   : > { %510 = vmatpush.msra.mxu3 %v482_v35 }
  0x44   : > { %388 = vmatmul.f32.gmra.mxu0 %v317_v34 }
  0xa0   : > { %v409_v36 = vpop.f32.mrf.mxu1 }
  0xa8   : > { %v412_v44 = vpop.f32.mrf.mxu1 }
  0xa9   : > { %v380_v41 = vpop.f32.mrf.mxu0 }
  0xaa   : > { %v381_v57 = vadd.f32 %v621_v50, %v380_v41 }
  0xac   : > { %v410_v62 = vadd.f32 %v409_v36, %v381_v57  ;;  %v481_v36 = vld [vmem:[%s923_s5 + $0x8] sm:$0xff] }
  0xad   : > { %511 = vmatpush.msra.mxu3 %v481_v36 }
  0xae   : > { %v421_v4 = vmax.f32 %v410_v62, 0.0 }
  0xaf   : > { %512 = vmatpush.msra.mxu3 %v480_v37 }
  0xb0   : > { %v415_v52 = vpop.f32.mrf.mxu1 }
  0xb1   : > { %v383_v47 = vpop.f32.mrf.mxu0 }
  0xb2   : > { %v384_v53 = vadd.f32 %v621_v50, %v383_v47 }
  0xb4   : > { %v413_v60 = vadd.f32 %v412_v44, %v384_v53 }
  0xb6   : > { %v422_v1 = vmax.f32 %v413_v60, 0.0 }
  0xb8   : > { %v418_v3 = vpop.f32.mrf.mxu1  ;;  %v426_v9 = vadd.f32 %v422_v1, %v421_v4 }
  0xb9   : > { %v386_v56 = vpop.f32.mrf.mxu0 }
  0xba   : > { %v387_v58 = vadd.f32 %v621_v50, %v386_v56 }
  0xbc   : > { %v416_v63 = vadd.f32 %v415_v52, %v387_v58 }
  0xbe   : > { %v423_v5 = vmax.f32 %v416_v63, 0.0 }
  0xc0   : > { %v427_v12 = vadd.f32 %v426_v9, %v423_v5 }
  0xc1   : > { %v389_v2 = vpop.f32.mrf.mxu0 }
  0xc2   : > { %v390_v6 = vadd.f32 %v621_v50, %v389_v2 }
  0xc4   : > { %v419_v10 = vadd.f32 %v418_v3, %v390_v6 }
  0xc6   : > { %v424_v13 = vmax.f32 %v419_v10, 0.0 }
  0xc8   : > { %v428_v15 = vadd.f32 %v427_v12, %v424_v13 }
  0xca   : > { %v429_v17 = vrot.slane %v428_v15, 4 }
  0xcc   : > { %v430_v19 = vadd.f32 %v429_v17, %v428_v15 }
  0xce   : > { %v431_v21 = vrot.slane %v430_v19, 2 }
  0xd0   : > { %v432_v23 = vadd.f32 %v431_v21, %v430_v19 }
  0xd2   : > { %v433_v25 = vrot.slane %v432_v23, 1 }
  0xd4   : > { %v434_v28 = vadd.f32 %v433_v25, %v432_v23 }
  0xd6   : > { %v435_v30 = vadd.f32 %v434_v28, %v425_v27 }
  0xd8   : > { %436 = vst [vmem:[#allocation2] sm:$0x1] %v435_v30 }
  0xdf   : > { %v440_v33 = vld [vmem:[#allocation2] sm:$0x1] }
  0xe0   : > { %v441_v34 = vmul.f32 0.00390625, %v440_v33 }
  0xe2   : > { %475 = vmatmul.f32.vlgmr.msra.gmra.mxu2 %v441_v34 }
 0x165   : > { %v476_v39 = vpop.f32.mrf.mxu2 }
 0x166   : > { %v477_v40 = vadd.f32 %v476_v39, %v458_v38 }
 0x168   : > { %v479_v41 = vmax.f32 %v477_v40, 0.0 }
 0x16a   : > { %513 = vmatmul.f32.vlgmr.msra.gmra.mxu3 %v479_v41 }
 0x1ed   : > { %v514_v43 = vpop.f32.mrf.mxu3 }
 0x1ee   : > { %v515_v44 = vadd.f32 %v514_v43, %v496_v42 }
 0x1f0   : > { %517 = vst [vmem:[%s305_s21] sm:$0x1] %v515_v44 }
 0x1f1 PF: > { %s17_s26 = sadd.s32 1, %s644_s26   ;;  %s926_s24 = smov %s640_s25 }
 0x1f2   : > { %p14_p5 = scmp.ge.s32.totalorder %s17_s26, 4   ;;  %s927_s25 = smov %s929_s27 }
 0x1f4   :  { %16 = sbr.rel (!%p14_p5) target bundleno = 2 (0x2), region = 86 }

// kernel: color_expert_forward.3
= control target key start
LH: loop header
LB: loop body
LE: loop exit
PB: predicated region body
PF: predicated region fallthrough
CT: control target
= control target key end

     0   :  { %s1722_s0 = inlined_call_operand.vmem [shape: f32[2,8,2], index: 0, kind: input, shape index: {}]   ;;  %s1723_s1 = inlined_call_operand.vmem [shape: f32[2,64], index: 1, kind: input, shape index: {}]   ;;  %s1724_s2 = inlined_call_operand.vmem [shape: f32[2,1,128], index: 2, kind: input, shape index: {}]   ;;  %s1725_s3 = inlined_call_operand.vmem [shape: f32[64,128], index: 3, kind: input, shape index: {}]   ;;  %s1726_s4 = inlined_call_operand.vmem [shape: f32[64,128], index: 4, kind: input, shape index: {}]   ;;  %s1727_s5 = inlined_call_operand.vmem [shape: f32[128,128], index: 5, kind: input, shape index: {}]   ;;  %s1728_s6 = inlined_call_operand.vmem [shape: f32[1,128], index: 6, kind: input, shape index: {}]   ;;  %s1729_s7 = inlined_call_operand.vmem [shape: f32[128,16], index: 7, kind: input, shape index: {}]   ;;  %s1730_s8 = inlined_call_operand.vmem [shape: f32[1,16], index: 8, kind: input, shape index: {}]   ;;  %s1731_s9 = inlined_call_operand.vmem [shape: f32[16,32], index: 9, kind: input, shape index: {}]   ;;  %s1732_s10 = inlined_call_operand.vmem [shape: f32[1,32], index: 10, kind: input, shape index: {}]   ;;  %s1733_s11 = inlined_call_operand.vmem [shape: f32[32,16], index: 11, kind: input, shape index: {}]   ;;  %s1734_s12 = inlined_call_operand.vmem [shape: f32[1,16], index: 12, kind: input, shape index: {}]   ;;  %s1735_s13 = inlined_call_operand.hbm [shape: f32[2,8,16], index: 13, kind: output, shape index: {}]  }
   0x1   :  { %1739 = sst [smem:[#allocation9_spill]] %s1722_s0 }
   0x2   :  { %1740 = sst [smem:[#allocation10_spill]] %s1723_s1 }
   0x3   :  { %18 = vsyncpa [#allocation3], 0 }
   0x4   :  { %20 = vsyncpa [#allocation3 + $0x1], 0  ;;  %s1364_s25 = smov 0   ;;  %s1366_s26 = smov 0  }
   0x5   :  { %s1368_s27 = smov 0   ;;  %s1370_s28 = smov 0  }
   0x6   :  { %s1372_s29 = smov 0   ;;  %s1374_s30 = smov 0  }
   0x7 LB: > { %1741 = sst [smem:[#allocation5_spill]] %s1272_s27  ;;  %s1113_s14 = sadd.s32 4294967295, %s1284_s30   ;;  %s1284_s30 = sphi %s1374_s30, %s26_s30   ;;  %s1280_s29 = sphi %s1372_s29, %s1755_s29   ;;  %s1276_s28 = sphi %s1370_s28, %s1754_s28   ;;  %s1272_s27 = sphi %s1368_s27, %s1753_s27   ;;  %s1268_s26 = sphi %s1366_s26, %s1757_s26   ;;  %s1264_s25 = sphi %s1364_s25, %s1756_s25  }
   0x8   : > { %1742 = sst [smem:[#allocation6_spill]] %s1280_s29  ;;  %s1114_s15 = sadd.s32 4294967294, %s1284_s30  }
   0x9   : > { %s38_s16 = sadd.s32 1, %s1280_s29  ;;  %s332_s17 = sadd.s32 1, %s1272_s27 }
   0xa   : > { %p40_p0 = scmp.ge.s32.totalorder %s38_s16, 2  ;;  %p342_p1 = scmp.ne.s32.totalorder %s1272_s27, %s1268_s26 }
   0xb   : > { %p343_p2 = scmp.eq.s32.totalorder %s1113_s14, 1  ;;  %p348_p3 = scmp.ne.s32.totalorder %s1268_s26, %s1264_s25 }
   0xc   : > { %s1759_s16 = smov (%p40_p0, %s38_s16), 0  ;;  %p349_p5 = scmp.eq.s32.totalorder %s1114_s15, 1 }
   0xd   : > { %1743 = sst [smem:[#allocation7_spill]] %s1759_s16  ;;  %p1404_p4 = por %p343_p2, %p342_p1 }
   0xe   : > { %s327_s19 = ssub.s32 %s1280_s29, %s1759_s16  ;;  %p1117_p6 = scmp.ge.s32.totalorder %s1284_s30, 1 }
   0xf   : > { %p330_p7 = scmp.eq.s32.totalorder %s327_s19, 0  ;;  %p1411_p8 = por %p349_p5, %p348_p3 }
  0x10   : > { %p416_p9 = scmp.lt.s32.totalorder %s1284_s30, 3 }
  0x11   : > { %s1417_s21 = scalar_select %p330_p7, %s1272_s27, %s332_s17  }
  0x12   : > { %p417_p10 = pnand %p1117_p6, %p416_p9 }
  0x13   : > { %1746 = sst [smem:[#allocation8_spill]] %s1417_s21  ;;  %p465_p11 = scmp.lt.s32.totalorder (!%p417_p10), %s1276_s28, 1 }
  0x14   : > { %420 = sbr.rel (%p417_p10) target bundleno = 919 (0x397), region = 72  ;;  %s1747_s0 = sld [smem:[#allocation9_spill]] (!%p417_p10) }
  0x15   : > { %s1748_s1 = sld [smem:[#allocation10_spill]] (!%p417_p10)  ;;  %s462_s19 = sand.u32 (!%p417_p10), 1, %s1268_s26  }
  0x16   : > { %s1118_s16 = sshll.u32 (!%p417_p10), %s462_s19, 3  ;;  %s1131_s27 = sshll.u32 (!%p417_p10), %s1276_s28, 3 }
  0x19   : > { %v1286_v0 = vmov 0   ;;  %s1422_s22 = scalar_select %p465_p11, %s1276_s28, 1  ;;  %v1287_v2 = vmov 1   ;;  %v816_v4 = vld [vmem:[%s1726_s4 + $0x38] sm:$0xff]  ;;  %v815_v6 = vld [vmem:[%s1726_s4 + $0x30] sm:$0xff]  ;;  %v814_v8 = vld [vmem:[%s1726_s4 + $0x28] sm:$0xff] }
  0x1a   : > { %1197 = vset.pattern.permute.xlu0 %v1286_v0  ;;  %v808_v5 = vld [vmem:[%s1725_s3 + $0x38] sm:$0xff]  ;;  %829 = vmatpush.msra.mxu0 %v816_v4  ;;  %v807_v7 = vld [vmem:[%s1725_s3 + $0x30] sm:$0xff]  ;;  %v806_v9 = vld [vmem:[%s1725_s3 + $0x28] sm:$0xff]  ;;  %v1288_v37 = vmov 2102212464  }
  0x1b   : > { %s1119_s23 = sshll.u32 %s1422_s22, 3  ;;  %852 = vmatpush.msra.mxu1 %v808_v5  ;;  %v813_v10 = vld [vmem:[%s1726_s4 + $0x20] sm:$0xff]  ;;  %v812_v14 = vld [vmem:[%s1726_s4 + $0x18] sm:$0xff]  ;;  %v811_v16 = vld [vmem:[%s1726_s4 + $0x10] sm:$0xff]  ;;  %v1289_v39 = vmov 920167782  }
  0x1c   : > { %s471_s15 = scalar_lea.vmem %s1747_s0, %s1119_s23  ;;  %830 = vmatpush.msra.mxu0 %v815_v6  ;;  %v805_v11 = vld [vmem:[%s1725_s3 + $0x20] sm:$0xff]  ;;  %v804_v15 = vld [vmem:[%s1725_s3 + $0x18] sm:$0xff]  ;;  %v803_v17 = vld [vmem:[%s1725_s3 + $0x10] sm:$0xff]  ;;  %v1290_v42 = vmov 1326507024   ;;  %s1028_s23 = scalar_lea.hbm %s1735_s13, %s1131_s27 }
  0x1d   : > { %v475_v1 = vld [vmem:[%s471_s15] sm:$0xff]  ;;  %853 = vmatpush.msra.mxu1 %v807_v7  ;;  %v810_v21 = vld [vmem:[%s1726_s4 + $0x8] sm:$0xff]  ;;  %v1291_v44 = vmov 683565275   ;;  %v1292_v46 = vmov 2475754826   ;;  %s1751_s15 = scalar_lea.vmem %s1724_s2, %s1422_s22 }
  0x1e   : > { %479 = vperm.xlu0 %1197, %v475_v1   ;;  %v1199_v12 = vld [vmem:[%s1748_s1] ss:$0 sm:$0xff]  ;;  %831 = vmatpush.msra.mxu0 %v814_v8  ;;  %v1200_v13 = vld [vmem:[%s1748_s1 + $0x1] ss:$0 sm:$0xff]  ;;  %v802_v22 = vld [vmem:[%s1725_s3 + $0x8] sm:$0xff]  ;;  %s1032_s29 = sshll.u32 %s1028_s23, 4  ;;  %s1033_s29 = int_to_ptr.hbm [resolvable:$true] %s1032_s29 }
  0x1f   : > { %854 = vmatpush.msra.mxu1 %v806_v9  ;;  %v809_v24 = vld [vmem:[%s1726_s4] sm:$0xff]  ;;  %v1293_v49 = vmov 2131351028   ;;  %s1017_s0 = scalar_lea.sflag [#allocation3], %s462_s19  ;;  %s1220_s28 = sshra.s32 %s1033_s29, 4  ;;  %s1221_s28 = int_to_ptr.hbm [resolvable:$true] %s1220_s28 }
  0x20   : > { %832 = vmatpush.msra.mxu0 %v813_v10  ;;  %v801_v25 = vld [vmem:[%s1725_s3] sm:$0xff]  ;;  %s1222_s1 = scalar_lea.hbm %s1221_s28, 8  ;;  %p1227_p1 = scmp.lt.s32.totalorder %s1221_s28, %s1735_s13 }
  0x21   : > { %855 = vmatpush.msra.mxu1 %v805_v11  ;;  %p1223_p12 = scmp.ne.s32.totalorder %s1221_s28, %s1222_s1 }
  0x22   : > { %833 = vmatpush.msra.mxu0 %v812_v14 }
  0x23   : > { %856 = vmatpush.msra.mxu1 %v804_v15  ;;  %p1224_p13 = pnand %p1223_p12, %p1404_p4 }
  0x24   : > { %834 = vmatpush.msra.mxu0 %v811_v16 }
  0x25   : > { %857 = vmatpush.msra.mxu1 %v803_v17  ;;  %p1225_p0 = pneg %p1224_p13 }
  0x26   : > { %1198 = vset.pattern.permute.xlu0 %v1287_v2  ;;  %835 = vmatpush.msra.mxu0 %v810_v21 }
  0x27   : > { %486 = vperm.xlu0 %1198, %v475_v1   ;;  %858 = vmatpush.msra.mxu1 %v802_v22 }
  0x28   : > { %836 = vmatpush.msra.mxu0 %v809_v24 }
  0x29   : > { %859 = vmatpush.msra.mxu1 %v801_v25 }
  0x90   : > { %v480_v3 = vpop.permute.xlu0 %479 }
  0x91   : > { %v483_v19 = vmul.f32 %v1199_v12, %v480_v3 }
  0x99   : > { %v487_v18 = vpop.permute.xlu0 %486 }
  0x9a   : > { %v490_v20 = vmul.f32 %v1200_v13, %v487_v18 }
  0x9c   : > { %v1476_v23 = vadd.f32 %v490_v20, %v483_v19 }
  0x9e   : > { %v495_v26 = vand.u32 2139095040, %v1476_v23  ;;  %v492_v29 = vand.u32 2147483647, %v1476_v23  ;;  %vm494_vm12 = vcmp.lt.s32.totalorder %v1476_v23, 0 }
  0xa0   : > { %v496_v27 = vshrl.u32 %v495_v26, 23  ;;  %v499_v31 = vand.u32 8388607, %v492_v29  ;;  %vm1556_vm13 = vcmp.le.f32.partialorder %v492_v29, 0.7853982  ;;  %v878_v29 = vld [vmem:[%s1727_s5 + $0x40] sm:$0xff] }
  0xa2   : > { %v1120_v28 = vadd.s32 4294967169, %v496_v27  ;;  %v500_v35 = vor.u32 8388608, %v499_v31 }
  0xa4   : > { %v502_v30 = vadd.s32 1, %v1120_v28  ;;  %v1497_v56 = vshll.u32 %v500_v35, 8 }
  0xa6   : > { %vm503_vm0 = vcmp.gt.s32.totalorder %v502_v30, 0  ;;  %v541_v3 = vand.u32 65535, %v1497_v56  ;;  %v542_v5 = vshrl.u32 %v1497_v56, 16 }
  0xa7   : > { %v504_v32 = vsel %vm503_vm0, %v502_v30, 0 }
  0xa8   : > { %v506_v33 = vand.u32 31, %v504_v32  ;;  %v1490_v36 = vshrl.u32 %v504_v32, 5 }
  0xaa   : > { %v1488_v34 = vsub.s32 32, %v506_v33  ;;  %v518_v38 = vshll.u32 %v1288_v37, %v506_v33  ;;  %v521_v40 = vshll.u32 %v1289_v39, %v506_v33  ;;  %v509_v45 = vshll.u32 %v1291_v44, %v506_v33 }
  0xab   : > { %v512_v48 = vshll.u32 %v1292_v46, %v506_v33  ;;  %v515_v51 = vshll.u32 %v1293_v49, %v506_v33  ;;  %vm527_vm1 = vcmp.lt.s32.totalorder %v1490_v36, 4  ;;  %vm524_vm2 = vcmp.lt.s32.totalorder %v1490_v36, 1 }
  0xac   : > { %v519_v41 = vshrl.u32 %v1289_v39, %v1488_v34  ;;  %v522_v43 = vshrl.u32 %v1290_v42, %v1488_v34  ;;  %v510_v47 = vshrl.u32 %v1292_v46, %v1488_v34  ;;  %v513_v50 = vshrl.u32 %v1293_v49, %v1488_v34 }
  0xad   : > { %v516_v52 = vshrl.u32 %v1288_v37, %v1488_v34  ;;  %vm526_vm3 = vcmp.lt.s32.totalorder %v1490_v36, 3  ;;  %vm525_vm4 = vcmp.lt.s32.totalorder %v1490_v36, 2  ;;  %v508_v30 = vshrl.u32 %v1291_v44, %v1488_v34 }
  0xae   : > { %v520_v53 = vor.u32 %v519_v41, %v518_v38  ;;  %v523_v54 = vor.u32 %v522_v43, %v521_v40  ;;  %v511_v55 = vor.u32 %v510_v47, %v509_v45  ;;  %v514_v57 = vor.u32 %v513_v50, %v512_v48 }
  0xaf   : > { %v517_v58 = vor.u32 %v516_v52, %v515_v51 }
  0xb0   : > { %v533_v59 = vsel %vm527_vm1, %v520_v53, 920167782  ;;  %v537_v60 = vsel %vm527_vm1, %v523_v54, 1326507024  ;;  %v532_v61 = vsel %vm524_vm2, %v511_v55, %v514_v57  ;;  %v528_v38 = vsel %vm524_vm2, %v508_v30, %v511_v55  ;;  %v876_v30 = vld [vmem:[%s1727_s5 + $0x30] sm:$0xff] }
  0xb1   : > { %v534_v62 = vsel %vm526_vm3, %v517_v58, %v533_v59  ;;  %v536_v63 = vsel %vm524_vm2, %v514_v57, %v517_v58  ;;  %v538_v2 = vsel %vm526_vm3, %v520_v53, %v537_v60  ;;  %v529_v26 = vsel %vm527_vm1, %v517_v58, 2102212464 }
  0xb2   : > { %v535_v1 = vsel %vm525_vm4, %v532_v61, %v534_v62  ;;  %v539_v4 = vsel %vm525_vm4, %v536_v63, %v538_v2  ;;  %v530_v39 = vsel %vm526_vm3, %v514_v57, %v529_v26  ;;  %v877_v26 = vld [vmem:[%s1727_s5 + $0x38] sm:$0xff]  ;;  %vm817_vm1 = vcmask 523264  }
  0xb3   : > { %v565_v6 = vand.u32 65535, %v535_v1  ;;  %v566_v7 = vshrl.u32 %v535_v1, 16  ;;  %v543_v8 = vand.u32 65535, %v539_v4  ;;  %v544_v9 = vshrl.u32 %v539_v4, 16 }
  0xb4   : > { %v531_v44 = vsel %vm525_vm4, %v528_v38, %v530_v39 }
  0xb5   : > { %v568_v10 = vmul.u32 %v566_v7, %v541_v3  ;;  %v569_v11 = vmul.u32 %v565_v6, %v542_v5  ;;  %v546_v12 = vmul.u32 %v544_v9, %v541_v3  ;;  %v547_v13 = vmul.u32 %v543_v8, %v542_v5 }
  0xb6   : > { %v567_v14 = vmul.u32 %v565_v6, %v541_v3  ;;  %v545_v16 = vmul.u32 %v543_v8, %v541_v3  ;;  %v570_v18 = vmul.u32 %v566_v7, %v542_v5  ;;  %v548_v19 = vmul.u32 %v544_v9, %v542_v5  ;;  %v885_v5 = vld [vmem:[%s1727_s5 + $0x78] sm:$0xff]  ;;  %v884_v6 = vld [vmem:[%s1727_s5 + $0x70] sm:$0xff]  ;;  %v883_v8 = vld [vmem:[%s1727_s5 + $0x68] sm:$0xff] }
  0xb7   : > { %v571_v15 = vshll.u32 %v568_v10, 16  ;;  %v549_v17 = vshll.u32 %v546_v12, 16  ;;  %v573_v20 = vshll.u32 %v569_v11, 16  ;;  %v551_v22 = vshll.u32 %v547_v13, 16  ;;  %890 = vmatpush.msra.mxu2 %v885_v5  ;;  %v916_v5 = vld [vmem:[%s1729_s7 + $0x28] sm:$0xff] }
  0xb8   : > { %v572_v35 = vshrl.u32 %v568_v10, 16  ;;  %v550_v40 = vshrl.u32 %v546_v12, 16  ;;  %v574_v42 = vshrl.u32 %v569_v11, 16  ;;  %v552_v45 = vshrl.u32 %v547_v13, 16  ;;  %v882_v11 = vld [vmem:[%s1727_s5 + $0x60] sm:$0xff]  ;;  %v881_v13 = vld [vmem:[%s1727_s5 + $0x58] sm:$0xff] }
  0xb9   : > { %vm575_vm5 = vc.u32 %v567_v14, %v571_v15  ;;  %v577_v21 = vadd.s32 %v571_v15, %v567_v14  ;;  %vm553_vm6 = vc.u32 %v545_v16, %v549_v17  ;;  %v555_v24 = vadd.s32 %v549_v17, %v545_v16  ;;  %891 = vmatpush.msra.mxu2 %v884_v6  ;;  %v880_v15 = vld [vmem:[%s1727_s5 + $0x50] sm:$0xff]  ;;  %v915_v6 = vld [vmem:[%s1729_s7 + $0x20] sm:$0xff] }
  0xba   : > { %v576_v25 = vsel %vm575_vm5, 1, %v1286_v0  ;;  %v554_v27 = vsel %vm553_vm6, 1, %v1286_v0  ;;  %v585_v49 = vmul.u32 %v1497_v56, %v531_v44  ;;  %vm635_vm5 = vweird.f32 %v1476_v23  ;;  %v911_v16 = vld [vmem:[%s1729_s7] sm:$0xff] }
  0xbb   : > { %v578_v28 = vadd.s32 %v576_v25, %v570_v18  ;;  %vm579_vm7 = vc.u32 %v577_v21, %v573_v20  ;;  %v556_v31 = vadd.s32 %v554_v27, %v548_v19  ;;  %vm557_vm8 = vc.u32 %v555_v24, %v551_v22  ;;  %892 = vmatpush.msra.mxu2 %v883_v8  ;;  %v1201_v8 = vld [vmem:[%s1751_s15] ss:$0 sm:$0xff]  ;;  %s464_s15 = scalar_lea.vmem [#allocation2], %s1118_s16  ;;  %s1226_s16 = scalar_lea.hbm %s1735_s13, 16 }
  0xbc   : > { %v580_v32 = vsel %vm579_vm7, 1, %v1286_v0  ;;  %v558_v33 = vsel %vm557_vm8, 1, %v1286_v0  ;;  %v581_v0 = vadd.s32 %v577_v21, %v573_v20  ;;  %v879_v20 = vld [vmem:[%s1727_s5 + $0x48] sm:$0xff]  ;;  %vm958_vm6 = vcmask 130048   ;;  %s1030_s17 = sshll.u32 %s464_s15, 4  ;;  %p1228_p2 = scmp.lt.s32.totalorder %s1226_s16, %s1222_s1  ;;  %s1031_s17 = int_to_ptr.vmem [resolvable:$true] %s1030_s17 }
  0xbd   : > { %v582_v37 = vadd.s32 %v580_v32, %v578_v28  ;;  %v560_v41 = vadd.s32 %v558_v33, %v556_v31  ;;  %893 = vmatpush.msra.mxu2 %v882_v11  ;;  %vm991_vm7 = vcmask 261120  }
  0xbe   : > { %p1229_p3 = por %p1228_p2, %p1227_p1 }
  0xbf   : > { %v583_v43 = vadd.s32 %v582_v37, %v572_v35  ;;  %v561_v34 = vadd.s32 %v560_v41, %v550_v40  ;;  %894 = vmatpush.msra.mxu2 %v881_v13  ;;  %v875_v35 = vld [vmem:[%s1727_s5 + $0x28] sm:$0xff]  ;;  %v874_v40 = vld [vmem:[%s1727_s5 + $0x20] sm:$0xff] }
  0xc0   : > { %p1230_p5 = pnand %p1229_p3, %p1225_p0 }
  0xc1   : > { %v584_v46 = vadd.s32 %v583_v43, %v574_v42  ;;  %v562_v47 = vadd.s32 %v561_v34, %v552_v45  ;;  %895 = vmatpush.msra.mxu2 %v880_v15  ;;  %v912_v15 = vld [vmem:[%s1729_s7 + $0x8] sm:$0xff] }
  0xc3   : > { %v588_v48 = vadd.s32 1, %v584_v46  ;;  %vm587_vm9 = vc.u32 %v562_v47, %v581_v0  ;;  %v586_v61 = vadd.s32 %v581_v0, %v562_v47  ;;  %896 = vmatpush.msra.mxu2 %v879_v20 }
  0xc5   : > { %v589_v50 = vsel %vm587_vm9, %v588_v48, %v584_v46  ;;  %897 = vmatpush.msra.mxu2 %v878_v29  ;;  %v952_v29 = vld [vmem:[%s1731_s9] sm:$0xff] }
  0xc6   : > { %v590_v51 = vadd.s32 %v589_v50, %v585_v49 }
  0xc7   : > { %898 = vmatpush.msra.mxu2 %v877_v26 }
  0xc8   : > { %v591_v52 = vadd.s32 536870912, %v590_v51 }
  0xc9   : > { %899 = vmatpush.msra.mxu2 %v876_v30  ;;  %v984_v30 = vld [vmem:[%s1733_s11 + $0x8] sm:$0xff] }
  0xca   : > { %v592_v53 = vshrl.u32 %v591_v52, 30 }
  0xcb   : > { %900 = vmatpush.msra.mxu2 %v875_v35 }
  0xcc   : > { %v593_v54 = vshll.u32 %v592_v53, 30  ;;  %v616_v18 = vsub.s32 4, %v592_v53 }
  0xcd   : > { %901 = vmatpush.msra.mxu2 %v874_v40 }
  0xce   : > { %v594_v55 = vsub.s32 %v590_v51, %v593_v54  ;;  %v617_v25 = vsel %vm494_vm12, %v616_v18, %v592_v53  ;;  %v1202_v18 = vld [vmem:[%s1728_s6] ss:$0 sm:$0xff] }
  0xcf   : > { %v619_v31 = vsel %vm1556_vm13, 0, %v617_v25  ;;  %v1203_v25 = vld [vmem:[%s1730_s8] ss:$0 sm:$0xff] }
  0xd0   : > { %vm595_vm10 = vcmp.lt.s32.totalorder %v594_v55, 0  ;;  %v596_v57 = vsub.s32 0, %v594_v55  ;;  %v636_v39 = vadd.s32 3, %v619_v31  ;;  %v791_v34 = vand.u32 3, %v619_v31  ;;  %v983_v31 = vld [vmem:[%s1733_s11] sm:$0xff] }
  0xd2   : > { %v597_v58 = vsel %vm595_vm10, %v596_v57, %v594_v55  ;;  %v637_v44 = vand.u32 3, %v636_v39  ;;  %vm792_vm14 = vcmp.lt.s32.totalorder %v791_v34, 2  ;;  %vm793_vm15 = vcmp.eq.s32.totalorder %v791_v34, 0  ;;  %v873_v57 = vld [vmem:[%s1727_s5 + $0x18] sm:$0xff] }
  0xd3   : > { %v598_v59 = vclz %v597_v58  ;;  %vm796_vm0 = vcmp.eq.s32.totalorder %v791_v34, 2  ;;  %v872_v58 = vld [vmem:[%s1727_s5 + $0x10] sm:$0xff]  ;;  %902 = vmatpush.msra.mxu2 %v873_v57 }
  0xd4   : > { %vm638_vm2 = vcmp.lt.s32.totalorder %v637_v44, 2  ;;  %vm639_vm3 = vcmp.eq.s32.totalorder %v637_v44, 0  ;;  %vm642_vm4 = vcmp.eq.s32.totalorder %v637_v44, 2 }
  0xd5   : > { %v1121_v60 = vadd.s32 4294967294, %v598_v59  ;;  %903 = vmatpush.msra.mxu2 %v872_v58  ;;  %v870_v59 = vld [vmem:[%s1727_s5] sm:$0xff] }
  0xd7   : > { %vm1122_vm11 = vcmp.lt.s32.totalorder %v1121_v60, 0 }
  0xd8   : > { %v601_v36 = vsel %vm1122_vm11, 0, %v1121_v60  ;;  %v926_v60 = vld [vmem:[%s1729_s7 + $0x78] sm:$0xff] }
  0xd9   : > { %v602_v62 = vsub.s32 32, %v601_v36  ;;  %v606_v63 = vsub.s32 4294967266, %v601_v36  ;;  %v603_v1 = vshll.u32 %v594_v55, %v601_v36  ;;  %v925_v36 = vld [vmem:[%s1729_s7 + $0x70] sm:$0xff]  ;;  %931 = vmatpush.msra.mxu3 %v926_v60 }
  0xdb   : > { %v604_v2 = vshrl.u32 %v586_v61, %v602_v62  ;;  %v607_v56 = vadd.s32 127, %v606_v63  ;;  %v924_v61 = vld [vmem:[%s1729_s7 + $0x68] sm:$0xff]  ;;  %932 = vmatpush.msra.mxu3 %v925_v36  ;;  %v923_v62 = vld [vmem:[%s1729_s7 + $0x60] sm:$0xff]  ;;  %v922_v63 = vld [vmem:[%s1729_s7 + $0x58] sm:$0xff] }
  0xdd   : > { %v605_v3 = vor.u32 %v604_v2, %v603_v1  ;;  %v608_v4 = vshll.u32 %v607_v56, 23  ;;  %933 = vmatpush.msra.mxu3 %v924_v61  ;;  %v921_v1 = vld [vmem:[%s1729_s7 + $0x50] sm:$0xff]  ;;  %v920_v2 = vld [vmem:[%s1729_s7 + $0x48] sm:$0xff]  ;;  %v919_v56 = vld [vmem:[%s1729_s7 + $0x40] sm:$0xff] }
  0xdf   : > { %v609_v7 = vor.u32 4788187, %v608_v4  ;;  %v612_v10 = vcvt.s32.f32 %v605_v3  ;;  %934 = vmatpush.msra.mxu3 %v923_v62  ;;  %v918_v3 = vld [vmem:[%s1729_s7 + $0x38] sm:$0xff]  ;;  %v917_v4 = vld [vmem:[%s1729_s7 + $0x30] sm:$0xff] }
  0xe1   : > { %v610_v9 = vand.u32 2147483647, %v609_v7  ;;  %935 = vmatpush.msra.mxu3 %v922_v63  ;;  %v914_v7 = vld [vmem:[%s1729_s7 + $0x18] sm:$0xff] }
  0xe3   : > { %v613_v12 = vmul.f32 %v612_v10, %v610_v9  ;;  %936 = vmatpush.msra.mxu3 %v921_v1 }
  0xe5   : > { %v614_v14 = vxor.u32 2147483648, %v613_v12  ;;  %937 = vmatpush.msra.mxu3 %v920_v2 }
  0xe7   : > { %v615_v17 = vsel %vm494_vm12, %v614_v14, %v613_v12  ;;  %938 = vmatpush.msra.mxu3 %v919_v56  ;;  %v913_v14 = vld [vmem:[%s1729_s7 + $0x10] sm:$0xff] }
  0xe8   : > { %v618_v19 = vsel %vm1556_vm13, %v1476_v23, %v615_v17  ;;  %v871_v23 = vld [vmem:[%s1727_s5 + $0x8] sm:$0xff] }
  0xe9   : > { %v620_v21 = vmul.f32 %v618_v19, %v618_v19  ;;  %904 = vmatpush.msra.mxu2 %v871_v23  ;;  %939 = vmatpush.msra.mxu3 %v918_v3  ;;  %v953_v17 = vld [vmem:[%s1731_s9 + $0x8] sm:$0xff] }
  0xea   : > { %976 = vmatpush.msrb.mxu0 %v953_v17 }
  0xeb   : > { %v621_v22 = vmul.f32 -0.001358992, %v620_v21  ;;  %v628_v24 = vmul.f32 -0.00019511016, %v620_v21  ;;  %905 = vmatpush.msra.mxu2 %v870_v59  ;;  %940 = vmatpush.msra.mxu3 %v917_v4 }
  0xec   : > { %977 = vmatpush.msrb.mxu0 %v952_v29 }
  0xed   : > { %v622_v27 = vadd.f32 0.041655596, %v621_v22  ;;  %v629_v28 = vadd.f32 0.008332121, %v628_v24  ;;  %941 = vmatpush.msra.mxu3 %v916_v5  ;;  %v986_v22 = vld [vmem:[%s1733_s11 + $0x18] sm:$0xff]  ;;  %v985_v24 = vld [vmem:[%s1733_s11 + $0x10] sm:$0xff] }
  0xee   : > { %1007 = vmatpush.msrb.mxu1 %v986_v22 }
  0xef   : > { %v623_v32 = vmul.f32 %v622_v27, %v620_v21  ;;  %v630_v33 = vmul.f32 %v629_v28, %v620_v21  ;;  %942 = vmatpush.msra.mxu3 %v915_v6 }
  0xf0   : > { %1008 = vmatpush.msrb.mxu1 %v985_v24 }
  0xf1   : > { %v624_v37 = vadd.f32 -0.4999988, %v623_v32  ;;  %v631_v38 = vadd.f32 -0.16666654, %v630_v33  ;;  %943 = vmatpush.msra.mxu3 %v914_v7  ;;  %v1204_v32 = vld [vmem:[%s1732_s10] ss:$0 sm:$0xff] }
  0xf2   : > { %1009 = vmatpush.msrb.mxu1 %v984_v30 }
  0xf3   : > { %v625_v41 = vmul.f32 %v624_v37, %v620_v21  ;;  %v632_v42 = vmul.f32 %v631_v38, %v620_v21  ;;  %944 = vmatpush.msra.mxu3 %v913_v14  ;;  %v1205_v38 = vld [vmem:[%s1734_s12] ss:$0 sm:$0xff] }
  0xf4   : > { %1010 = vmatpush.msrb.mxu1 %v983_v31 }
  0xf5   : > { %v626_v43 = vadd.f32 1.0, %v625_v41  ;;  %v633_v45 = vadd.f32 1.0, %v632_v42  ;;  %945 = vmatpush.msra.mxu3 %v912_v15 }
  0xf7   : > { %v634_v46 = vmul.f32 %v633_v45, %v618_v19  ;;  %v643_v47 = vxor.u32 2147483648, %v626_v43  ;;  %946 = vmatpush.msra.mxu3 %v911_v16 }
  0xf9   : > { %v640_v0 = vxor.u32 2147483648, %v634_v46  ;;  %v798_v49 = vsel %vm796_vm0, %v643_v47, %v634_v46  ;;  %v644_v51 = vsel %vm642_vm4, %v643_v47, %v634_v46 }
  0xfb   : > { %v795_v48 = vsel %vm793_vm15, %v626_v43, %v640_v0  ;;  %v641_v50 = vsel %vm639_vm3, %v626_v43, %v640_v0 }
  0xfc   : > { %v799_v52 = vsel %vm792_vm14, %v795_v48, %v798_v49  ;;  %v645_v53 = vsel %vm638_vm2, %v641_v50, %v644_v51 }
  0xfd   : > { %v800_v54 = vsel %vm635_vm5, nan, %v799_v52  ;;  %v646_v55 = vsel %vm635_vm5, nan, %v645_v53 }
  0xfe   : > { %1126 = vmatmul.msk.f32.vlgmr.msra.gmra.mxu0 %vm817_vm1, %v800_v54  ;;  %1127 = vmatmul.msk.f32.vlgmr.msra.gmra.mxu1 %vm817_vm1, %v646_v55 }
 0x17b   : > { %v838_v9 = vpop.f32.mrf.mxu0  ;;  %v861_v10 = vpop.f32.mrf.mxu1 }
 0x17c   : > { %v862_v11 = vadd.f32 %v861_v10, %v838_v9 }
 0x17e   : > { %v868_v12 = vadd.f32 %v1201_v8, %v862_v11 }
 0x180   : > { %v869_v13 = vmax.f32 %v868_v12, 0.0 }
 0x182   : > { %906 = vmatmul.f32.vlgmr.msra.gmra.mxu2 %v869_v13 }
 0x205   : > { %v907_v19 = vpop.f32.mrf.mxu2 }
 0x206   : > { %v908_v20 = vadd.f32 %v1202_v18, %v907_v19 }
 0x208   : > { %v910_v21 = vmax.f32 %v908_v20, 0.0 }
 0x20a   : > { %947 = vmatmul.f32.vlgmr.msra.gmra.mxu3 %v910_v21 }
 0x28d   : > { %v948_v26 = vpop.f32.mrf.mxu3 }
 0x28e   : > { %v949_v27 = vadd.f32 %v1203_v25, %v948_v26 }
 0x290   : > { %v951_v28 = vmax.f32 %v949_v27, 0.0 }
 0x292   : > { %1128 = vmatmul.msk.f32.vlgmr.msrb.gmra.mxu0 %vm958_vm6, %v951_v28 }
 0x30f   : > { %v979_v33 = vpop.f32.mrf.mxu0 }
 0x310   : > { %v980_v35 = vadd.f32 %v1204_v32, %v979_v33 }
 0x312   : > { %v982_v37 = vmax.f32 %v980_v35, 0.0 }
 0x314   : > { %1129 = vmatmul.msk.f32.vlgmr.msrb.gmra.mxu1 %vm991_vm7, %v982_v37 }
 0x391   : > { %v1012_v39 = vpop.f32.mrf.mxu1 }
 0x392   : > { %v1013_v40 = vadd.f32 %v1205_v38, %v1012_v39 }
 0x394   : > { %1015 = vst.msk [vmem:[%s464_s15] sm:$0xff] %vm958_vm6, %v1013_v40 }
 0x395   : > { %1233 = shalt.err (!%p1230_p5)
}
 0x396   : > { %1134 = dma.vmem_to_hbm [thread:$0]  (%p1404_p4), %s1031_s17, 128, %s1033_s29, %s1017_s0  }
 0x397 PF: > { %p1140_p6 = scmp.ge.s32.totalorder %s1284_s30, 2  ;;  %s1044_s19 = sand.u32 1, %s1264_s25  }
 0x398   : > { %s1045_s24 = scalar_lea.sflag [#allocation3], %s1044_s19 }
 0x399   : > { %p1137_p7 = pnand %p1140_p6, %p1411_p8 }
 0x39b   : > { %p1138_p9 = pneg %p1137_p7 }
 0x39d   : > { %1259 = dma.done.wait (%p1138_p9), %s1045_s24, 128  }
 0x39e   : > { %1261 = vsyncadd (%p1138_p9), %s1045_s24, 4294967168  ;;  %s26_s30 = sadd.s32 1, %s1284_s30   ;;  %s1752_s1 = sld [smem:[#allocation5_spill]] }
 0x39f   : > { %p23_p10 = scmp.ge.s32.totalorder %s26_s30, 4   ;;  %s1753_s27 = sld [smem:[#allocation8_spill]] }
 0x3a0   : > { %s1754_s28 = sld [smem:[#allocation6_spill]]  ;;  %s1756_s25 = smov %s1268_s26 }
 0x3a1   : > { %s1755_s29 = sld [smem:[#allocation7_spill]]  ;;  %25 = sbr.rel (!%p23_p10) target bundleno = 7 (0x7), region = 110 }
 0x3a4   : > { %s1757_s26 = smov %s1752_s1 }
 0x3a6   :  { %1051 = vsyncpa [#allocation3], 1 }
 0x3a7   :  { %1053 = vsyncpa [#allocation3 + $0x1], 1 }

</bundles_post_ra>
